<compile_context>
chip_gen: v6e
topology: v6e:2x2x1
jax: 0.10.0
libtpu: 0.0.40
codegen_flags: <defaults>
</compile_context>

<pallas_src>
import functools
import math

import jax
import jax.numpy as jnp
from jax import lax
from jax.experimental import pallas as pl
from jax.experimental.pallas import tpu as pltpu

block_size = 8   # max sequence length (causal window, per PyTorch module)
n_embd = 32      # C
head_size = 16   # H

# VMEM guard: rows (= batch_chunk * T) processed per grid step.  At this cap
# the per-step intermediates (x tile, qkv, scores) are only a few hundred KiB,
# comfortably inside the scoped-VMEM default on v5e/v6e/v7x.
_MAX_ROWS_PER_BLOCK = 2048


def _head_kernel(x_ref, wqkv_ref, o_ref, *, head_dim):
    # x_ref:    (Bb, T, C)   batch chunk
    # wqkv_ref: (C, 3*H)     fused [key | query * C**-0.5 | value] weights
    # o_ref:    (Bb, T, H)
    H = head_dim
    Bb, T, C = x_ref.shape

    x = x_ref[...]                                   # (Bb, T, C), float32
    w = wqkv_ref[...]                                # (C, 3H)

    # Single fused projection on the MXU.  jnp.dot needs 2-D operands, so
    # collapse the leading dims (layout no-op for T a multiple of 8).
    qkv = jnp.dot(x.reshape(Bb * T, C), w,
                  preferred_element_type=jnp.float32).reshape(Bb, T, 3 * H)
    k = qkv[..., :H]
    q = qkv[..., H:2 * H]      # query columns pre-scaled by C**-0.5
    v = qkv[..., 2 * H:]

    # Per-batch (T, T) attention scores.  The einsum contracts the head dim of
    # both operands (batched dot_general) -> no explicit k.T relayout, and the
    # work scales linearly in Bb instead of quadratically.
    scores = jnp.einsum("btd,bsd->bts", q, k,
                        preferred_element_type=jnp.float32)      # (Bb, T, T)

    # Causal mask (lower-triangular), identical to the PyTorch tril buffer.
    row = lax.broadcasted_iota(jnp.int32, (Bb, T, T), 1)
    col = lax.broadcasted_iota(jnp.int32, (Bb, T, T), 2)
    scores = jnp.where(col <= row, scores, -jnp.inf)

    # Numerically stable softmax with an EXACT divide.  (The approx EUP
    # reciprocal used previously has bf16-level error and broke parity.)
    scores = scores - jnp.max(scores, axis=-1, keepdims=True)
    p = jnp.exp(scores)                               # masked entries -> 0
    p = p / jnp.sum(p, axis=-1, keepdims=True)

    out = jnp.einsum("bts,bsd->btd", p, v,
                     preferred_element_type=jnp.float32)         # (Bb, T, H)
    o_ref[...] = out.astype(o_ref.dtype)


def _pick_batch_block(B, T):
    """Largest divisor of B that (a) keeps Bb*T <= _MAX_ROWS_PER_BLOCK and
    (b) targets a 2-way split so both v7x TensorCores get a grid step."""
    target = B // 2 if (B >= 2 and B % 2 == 0) else B
    target = max(1, min(target, max(1, _MAX_ROWS_PER_BLOCK // T)))
    for bb in range(target, 0, -1):
        if B % bb == 0:
            return bb
    return 1


def head_forward(x, w_key, w_query, w_value, *, batch_block=None):
    """Causal single-head attention matching the PyTorch `Head.forward`.

    x: (B, T, C); w_*: (C, H) (transpose of PyTorch's (H, C) nn.Linear weight).
    Returns (B, T, H).

    batch_block: batch elements per grid step.  Default: B//2 when B splits
    evenly (feeds both v7x TensorCores via the "parallel" grid axis), capped so
    the per-step tile stays VMEM-safe.
    """
    B, T, C = x.shape
    H = w_key.shape[1]

    # Fold the static C**-0.5 scale into the query weight and fuse K/Q/V into
    # a single (C, 3H) weight: one projection matmul + one weight DMA per step.
    scale = C ** (-0.5)
    w_qkv = jnp.concatenate([w_key, w_query * scale, w_value], axis=1)

    if batch_block is None:
        batch_block = _pick_batch_block(B, T)
    assert B % batch_block == 0, "batch_block must divide B"
    num_blocks = B // batch_block

    kernel = functools.partial(_head_kernel, head_dim=H)

    out = pl.pallas_call(
        kernel,
        out_shape=jax.ShapeDtypeStruct((B, T, H), x.dtype),
        grid_spec=pltpu.PrefetchScalarGridSpec(
            num_scalar_prefetch=0,
            grid=(num_blocks,),
            in_specs=[
                # Batch chunk; trailing (T, C) are full dims -> tiling legal.
                pl.BlockSpec((batch_block, T, C), lambda i: (i, 0, 0)),
                # Fused weights, constant index -> fetched once per core.
                pl.BlockSpec((C, 3 * H), lambda i: (0, 0)),
            ],
            out_specs=pl.BlockSpec((batch_block, T, H), lambda i: (i, 0, 0)),
        ),
        compiler_params=pltpu.CompilerParams(
            dimension_semantics=("parallel",),
        ),
    )(x, w_qkv)

    return out


def head_reference(x, w_key, w_query, w_value):
    """Plain-JAX reference mirroring the PyTorch forward exactly."""
    B, T, C = x.shape
    k = x @ w_key
    q = x @ w_query
    v = x @ w_value
    wei = (q @ jnp.swapaxes(k, -2, -1)) * (C ** (-0.5))
    tril = jnp.tril(jnp.ones((block_size, block_size)))
    wei = jnp.where(tril[:T, :T] == 0, -jnp.inf, wei)
    wei = jax.nn.softmax(wei, axis=-1)
    return wei @ v


if __name__ == "__main__":
    # Full-precision f32 matmuls everywhere (kernel *and* reference) so the
    # comparison is not polluted by XLA's default bf16-pass f32 matmul on TPU.
    jax.config.update("jax_default_matmul_precision", "highest")

    key = jax.random.PRNGKey(0)
    kx, kk, kq, kv, kx2 = jax.random.split(key, 5)

    B, T, C, H = 2, block_size, n_embd, head_size
    x = jax.random.normal(kx, (B, T, C), dtype=jnp.float32)

    # Deterministic init matching nn.Linear default: U(-1/sqrt(fan_in), ...).
    bound = 1.0 / math.sqrt(C)
    w_key = jax.random.uniform(kk, (C, H), jnp.float32, -bound, bound)
    w_query = jax.random.uniform(kq, (C, H), jnp.float32, -bound, bound)
    w_value = jax.random.uniform(kv, (C, H), jnp.float32, -bound, bound)

    # Small default case (B=2 -> batch_block=1, grid=(2,)).
    out = jax.block_until_ready(head_forward(x, w_key, w_query, w_value))
    ref = head_reference(x, w_key, w_query, w_value)
    assert out.shape == (B, T, H)
    assert jnp.allclose(out, ref, atol=1e-4, rtol=1e-4), "mismatch vs reference (B=2)"

    # Larger batch exercising the multi-step parallel grid (B=16 -> bb=8, grid=(2,)).
    B2 = 16
    x2 = jax.random.normal(kx2, (B2, T, C), dtype=jnp.float32)
    out2 = jax.block_until_ready(head_forward(x2, w_key, w_query, w_value))
    ref2 = head_reference(x2, w_key, w_query, w_value)
    assert out2.shape == (B2, T, H)
    assert jnp.allclose(out2, ref2, atol=1e-4, rtol=1e-4), "mismatch vs reference (B=16)"

    print("KERNEL_OK")
</pallas_src>

<mosaic_0001>
module attributes {stable_mosaic.version = 11 : i64} {
  func.func @_head_kernel(%arg0: i32, %arg1: memref<1x8x32xf32, #tpu.memory_space<vmem>>, %arg2: memref<32x48xf32, #tpu.memory_space<vmem>>, %arg3: memref<1x8x16xf32, #tpu.memory_space<vmem>>) attributes {dimension_semantics = [#tpu.dimension_semantics<parallel>], iteration_bounds = array<i64: 2>, scalar_prefetch = 0 : i64, scratch_operands = 0 : i64, tpu.core_type = #tpu.core_type<tc>, window_params = [{transform_indices = @transform_0, window_bounds = array<i64: 1, 8, 32>}, {pipeline_mode = #tpu.pipeline_mode<synchronous>, transform_indices = @transform_1, window_bounds = array<i64: 32, 48>}, {transform_indices = @transform_2, window_bounds = array<i64: 1, 8, 16>}]} {
    %c0 = arith.constant 0 : index
    %c0_0 = arith.constant 0 : index
    %c0_1 = arith.constant 0 : index
    %0 = vector.load %arg1[%c0, %c0_0, %c0_1] : memref<1x8x32xf32, #tpu.memory_space<vmem>>, vector<1x8x32xf32>
    %c0_2 = arith.constant 0 : index
    %c0_3 = arith.constant 0 : index
    %1 = vector.load %arg2[%c0_2, %c0_3] : memref<32x48xf32, #tpu.memory_space<vmem>>, vector<32x48xf32>
    %2 = vector.shape_cast %0 : vector<1x8x32xf32> to vector<8x32xf32>
    %cst = arith.constant dense<0.000000e+00> : vector<8x48xf32>
    %3 = tpu.matmul %2, %1, %cst {dimension_numbers = #tpu.dot_dimension_numbers<[1], [0], [0], [1], [0, 0, 1, 1], [], []>, precision = #tpu.contract_precision<fp32>} : vector<8x32xf32>, vector<32x48xf32>, vector<8x48xf32> -> vector<8x48xf32>
    %4 = vector.shape_cast %3 : vector<8x48xf32> to vector<1x8x48xf32>
    %5 = vector.extract_strided_slice %4 {offsets = [0, 0, 0], sizes = [1, 8, 16], strides = [1, 1, 1]} : vector<1x8x48xf32> to vector<1x8x16xf32>
    %6 = vector.extract_strided_slice %4 {offsets = [0, 0, 16], sizes = [1, 8, 16], strides = [1, 1, 1]} : vector<1x8x48xf32> to vector<1x8x16xf32>
    %7 = vector.extract_strided_slice %4 {offsets = [0, 0, 32], sizes = [1, 8, 16], strides = [1, 1, 1]} : vector<1x8x48xf32> to vector<1x8x16xf32>
    "tpu.trace_start"() <{level = 10 : i32, message = "btd,bsd->bts"}> : () -> ()
    %cst_4 = arith.constant dense<0.000000e+00> : vector<1x8x8xf32>
    %8 = tpu.matmul %6, %5, %cst_4 {dimension_numbers = #tpu.dot_dimension_numbers<[2], [2], [1], [1], [0, 0, 0, 1, 1, 1], [0], [0]>, precision = #tpu.contract_precision<fp32>} : vector<1x8x16xf32>, vector<1x8x16xf32>, vector<1x8x8xf32> -> vector<1x8x8xf32>
    "tpu.trace_stop"() : () -> ()
    %9 = tpu.iota {dimensions = array<i32: 1>} : vector<1x8x8xi32>
    %10 = tpu.iota {dimensions = array<i32: 2>} : vector<1x8x8xi32>
    %11 = arith.cmpi sle, %10, %9 : vector<1x8x8xi32>
    %cst_5 = arith.constant 0xFF800000 : f32
    %12 = vector.broadcast %cst_5 : f32 to vector<1x8x8xf32>
    %13 = arith.select %11, %8, %12 : vector<1x8x8xi1>, vector<1x8x8xf32>
    %cst_6 = arith.constant dense<0xFF800000> : vector<1x8xf32>
    %14 = vector.multi_reduction <maximumf>, %13, %cst_6 [2] : vector<1x8x8xf32> to vector<1x8xf32>
    %15 = vector.shape_cast %14 : vector<1x8xf32> to vector<1x8x1xf32>
    %16 = vector.broadcast %15 : vector<1x8x1xf32> to vector<1x8x8xf32>
    %17 = arith.subf %13, %16 : vector<1x8x8xf32>
    %18 = math.exp %17 : vector<1x8x8xf32>
    %cst_7 = arith.constant dense<0.000000e+00> : vector<1x8xf32>
    %19 = vector.multi_reduction <add>, %18, %cst_7 [2] : vector<1x8x8xf32> to vector<1x8xf32>
    %20 = vector.shape_cast %19 : vector<1x8xf32> to vector<1x8x1xf32>
    %21 = vector.broadcast %20 : vector<1x8x1xf32> to vector<1x8x8xf32>
    %22 = arith.divf %18, %21 : vector<1x8x8xf32>
    "tpu.trace_start"() <{level = 10 : i32, message = "bts,bsd->btd"}> : () -> ()
    %cst_8 = arith.constant dense<0.000000e+00> : vector<1x8x16xf32>
    %23 = tpu.matmul %22, %7, %cst_8 {dimension_numbers = #tpu.dot_dimension_numbers<[2], [1], [1], [2], [0, 0, 0, 1, 1, 2], [0], [0]>, precision = #tpu.contract_precision<fp32>} : vector<1x8x8xf32>, vector<1x8x16xf32>, vector<1x8x16xf32> -> vector<1x8x16xf32>
    "tpu.trace_stop"() : () -> ()
    %c0_9 = arith.constant 0 : index
    %c0_10 = arith.constant 0 : index
    %c0_11 = arith.constant 0 : index
    %24 = vector.load %arg3[%c0_9, %c0_10, %c0_11] : memref<1x8x16xf32, #tpu.memory_space<vmem>>, vector<1x8x16xf32>
    tpu.vector_store %arg3[%c0_9, %c0_10, %c0_11], %23 {strides = array<i32>} : memref<1x8x16xf32, #tpu.memory_space<vmem>>, vector<1x8x16xf32>,
    return
  }
  func.func @transform_0(%arg0: i32) -> (i32, i32, i32) {
    %c0_i32 = arith.constant 0 : i32
    %c0_i32_0 = arith.constant 0 : i32
    %c0_i32_1 = arith.constant 0 : i32
    return %arg0, %c0_i32, %c0_i32_0 : i32, i32, i32
  }
  func.func @transform_1(%arg0: i32) -> (i32, i32) {
    %c0_i32 = arith.constant 0 : i32
    %c0_i32_0 = arith.constant 0 : i32
    %c0_i32_1 = arith.constant 0 : i32
    return %c0_i32, %c0_i32_0 : i32, i32
  }
  func.func @transform_2(%arg0: i32) -> (i32, i32, i32) {
    %c0_i32 = arith.constant 0 : i32
    %c0_i32_0 = arith.constant 0 : i32
    %c0_i32_1 = arith.constant 0 : i32
    return %arg0, %c0_i32, %c0_i32_0 : i32, i32, i32
  }
}

</mosaic_0001>

<bundles_post_ra>
// kernel: tpu_custom_call.1
= control target key start
LH: loop header
LB: loop body
LE: loop exit
PB: predicated region body
PF: predicated region fallthrough
CT: control target
= control target key end

     0   :  { %7 = vsyncpa [#allocation3], 0  ;;  %s2367_s0 = inlined_call_operand.hbm [shape: f32[2,8,32], index: 0, kind: input, shape index: {}]   ;;  %s2368_s1 = inlined_call_operand.hbm [shape: f32[32,48], index: 1, kind: input, shape index: {}]   ;;  %s2369_s2 = inlined_call_operand.hbm [shape: f32[2,8,16], index: 2, kind: output, shape index: {}]  }
   0x1   :  { %9 = vsyncpa [#allocation3 + $0x1], 0 }
   0x2   :  { %10 = vsyncpa [#allocation6], 0 }
   0x3   :  { %11 = vsyncpa [#allocation4], 0 }
   0x4   :  { %13 = vsyncpa [#allocation4 + $0x1], 0  ;;  %s2096_s9 = smov 0   ;;  %s2098_s10 = smov 0  }
   0x5   :  { %s2100_s11 = smov 0   ;;  %s2102_s12 = smov 0  }
   0x6 LB: > { %s2117_s13 = sadd.s32 4294967295, %s2070_s12   ;;  %s1687_s14 = sadd.s32 4294967294, %s2070_s12   ;;  %s2070_s12 = sphi %s2102_s12, %s2391_s12   ;;  %s2066_s11 = sphi %s2100_s11, %s2390_s11   ;;  %s2062_s10 = sphi %s2098_s10, %s2389_s10   ;;  %s2058_s9 = sphi %s2096_s9, %s2388_s9  }
   0x7   : > { %p39_p0 = scmp.ne.s32.totalorder %s2062_s10, %s2058_s9  ;;  %p2370_p1 = scmp.eq.s32.totalorder %s2117_s13, 0 }
   0x8   : > { %p90_p3 = scmp.eq.s32.totalorder %s1687_s14, 1  ;;  %p1688_p5 = scmp.ge.s32.totalorder %s2070_s12, 1 }
   0x9   : > { %p2126_p4 = por %p2370_p1, %p39_p0  ;;  %p97_p7 = scmp.lt.s32.totalorder %s2070_s12, 3 }
   0xa   : > { %p2131_p6 = por %p90_p3, %p39_p0  ;;  %s2072_s18 = smov [#allocation5]  }
   0xb   : > { %s2374_s15 = scalar_select %p2126_p4, 1, 0 }
   0xc   : > { %s2375_s16 = scalar_select %p2131_p6, 1, 0 }
   0xd   : > { %p2136_p8 = pnand %p1688_p5, %p97_p7  ;;  %s109_s19 = sshll.u32 %s2072_s18, 4  ;;  %s110_s19 = int_to_ptr.vmem [resolvable:$true] %s109_s19 }
   0xe   : > { %s2150_s21 = sadd.s32 1, %s2070_s12   ;;  %s26_s22 = sadd.s32 1, %s2066_s11 }
   0xf   : > { %s2376_s17 = scalar_select %p2136_p8, 1, 0 }
  0x10   : > { %p1889_p9 = pneg %p2136_p8  ;;  %s23_s23 = ssub.s32 %s2070_s12, %s2150_s21 }
  0x11   : > { %s1959_s24 = scalar_lea.vmem %s110_s19, 512  ;;  %p1967_p5 = scmp.lt.s32.totalorder %s110_s19, %s110_s19 }
  0x12   : > { %p2145_p11 = pnand %p1889_p9, %p2370_p1  ;;  %p1960_p13 = scmp.ne.s32.totalorder %s110_s19, %s1959_s24 }
  0x13   : > { %p1968_p7 = scmp.lt.s32.totalorder %s1959_s24, %s1959_s24 }
  0x14   : > { %p1950_p12 = pneg %p2145_p11 }
  0x15   : > { %p1969_p10 = por %p1968_p7, %p1967_p5 }
  0x16   : > { %p1962_p0 = pnand %p1960_p13, %p1950_p12 }
  0x18   : > { %p1963_p3 = pneg %p1962_p0 }
  0x1a   : > { %p1970_p2 = pnand %p1969_p10, %p1963_p3 }
  0x1c   : > { %1973 = shalt.err (!%p1970_p2)
}
  0x1d   : > { %s2073_s25 = smov 128   ;;  %s2074_s26 = smov 8  }
  0x1e   : > { %1892 = dma.hbm_to_vmem [thread:$0]  (!%p2145_p11), %s2368_s1, 512, %s110_s19, [#allocation6], %s2073_s25, %s2073_s25, %s2074_s26  }
  0x1f   : > { %p24_p9 = scmp.eq.s32.totalorder %s23_s23, 0  ;;  %p33_p12 = scmp.ne.s32.totalorder %s2066_s11, %s2062_s10 }
  0x20   : > { %p34_p10 = scmp.eq.s32.totalorder %s2070_s12, 0  ;;  %p1902_p2 = scmp.lt.s32.totalorder %s2070_s12, 2 }
  0x21   : > { %s2167_s29 = scalar_select %p24_p9, %s2066_s11, %s26_s22  }
  0x22   : > { %p35_p13 = por %p34_p10, %p33_p12  ;;  %p2378_p0 = scmp.eq.s32.totalorder %s2117_s13, 1 }
  0x23   : > { %s123_s3 = sand.u32 1, %s2066_s11   ;;  %s1692_s4 = sshll.u32 %s2070_s12, 7 }
  0x24   : > { %p2171_p3 = por %p2378_p0, %p33_p12  ;;  %s1691_s5 = sshll.u32 %s123_s3, 3 }
  0x25   : > { %s2180_s8 = scalar_lea.hbm %s2367_s0, %s1692_s4  ;;  %s127_s14 = scalar_lea.vmem [#allocation2], %s1691_s5 }
  0x26   : > { %s2379_s30 = scalar_select %p2171_p3, 1, 0 }
  0x27   : > { %s134_s18 = sshll.u32 %s127_s14, 4  ;;  %p2182_p11 = pnand %p1902_p2, %p35_p13  ;;  %s135_s18 = int_to_ptr.vmem [resolvable:$true] %s134_s18 }
  0x28   : > { %s124_s20 = scalar_lea.sflag [#allocation3], %s123_s3  ;;  %s1974_s22 = scalar_lea.hbm %s2180_s8, 128 }
  0x29   : > { %p1975_p5 = scmp.ne.s32.totalorder %s2180_s8, %s1974_s22  ;;  %p1976_p7 = pneg %p2182_p11 }
  0x2a   : > { %s1979_s25 = scalar_lea.hbm %s2367_s0, 256  ;;  %p1980_p10 = scmp.lt.s32.totalorder %s2180_s8, %s2367_s0 }
  0x2b   : > { %p1977_p9 = pnand %p1976_p7, %p1975_p5  ;;  %p1981_p2 = scmp.lt.s32.totalorder %s1979_s25, %s1974_s22 }
  0x2d   : > { %p1978_p12 = pneg %p1977_p9  ;;  %p1982_p13 = por %p1981_p2, %p1980_p10 }
  0x2f   : > { %p1983_p0 = pnand %p1982_p13, %p1978_p12 }
  0x31   : > { %1986 = shalt.err (!%p1983_p0)
}
  0x32   : > { %s1987_s28 = scalar_lea.vmem %s135_s18, 128  ;;  %s2075_s3 = smov [#allocation2]  }
  0x33   : > { %p1988_p1 = scmp.ne.s32.totalorder %s135_s18, %s1987_s28  ;;  %s1992_s4 = sshll.u32 %s2075_s3, 4  ;;  %s1993_s4 = int_to_ptr.vmem [resolvable:$false] %s1992_s4 }
  0x34   : > { %s1994_s5 = scalar_lea.vmem %s1993_s4, 256  ;;  %p1995_p5 = scmp.lt.s32.totalorder %s135_s18, %s1993_s4 }
  0x35   : > { %p1990_p6 = pnand %p1988_p1, %p1976_p7  ;;  %p1996_p9 = scmp.lt.s32.totalorder %s1994_s5, %s1987_s28 }
  0x37   : > { %p1991_p3 = pneg %p1990_p6  ;;  %p1997_p4 = por %p1996_p9, %p1995_p5 }
  0x39   : > { %p1998_p8 = pnand %p1997_p4, %p1991_p3 }
  0x3b   : > { %2001 = shalt.err (!%p1998_p8)
}
  0x3c   : > { %1896 = dma.hbm_to_vmem [thread:$0]  (!%p2182_p11), %s2180_s8, 128, %s135_s18, %s124_s20  }
  0x3d   : > { %p2381_p12 = scmp.ne.s32.totalorder %s2376_s17, 0 }
  0x3e   : > { %s2203_s6 = sand.u32 (!%p2381_p12), 1, %s2062_s10   ;;  %p2382_p1 = scmp.ne.s32.totalorder (!%p2381_p12), %s2374_s15, 0 }
  0x3f   : > { %143 = sbr.rel (%p2381_p12) target bundleno = 1178 (0x49a), region = 28  ;;  %s1694_s7 = sshll.u32 (!%p2381_p12), %s2203_s6, 3 }
  0x40   : > { %s146_s14 = scalar_lea.sflag (!%p2381_p12), [#allocation3], %s2203_s6  ;;  %s149_s22 = scalar_lea.vmem (!%p2381_p12), [#allocation2], %s1694_s7 }
  0x44   : > { %2045 = dma.done.wait (%p2382_p1), %s146_s14, 128  }
  0x45   : > { %2047 = vsyncadd (%p2382_p1), %s146_s14, 4294967168  ;;  %p2383_p4 = scmp.eq.s32.totalorder %s2117_s13, 0 }
  0x47   : > { %2049 = dma.done.wait (%p2383_p4), [#allocation6], 512   ;;  %p2384_p6 = pmov %p2383_p4 }
  0x48   : > { %v2076_v0 = vmov 0.0   ;;  %vm2077_vm0 = vmmov 0   ;;  %vm179_vm1 = vcmask 261120   ;;  %v178_v1 = vld [vmem:[#allocation5 + $0x18] sm:$0xff]  ;;  %v177_v2 = vld [vmem:[#allocation5 + $0x10] sm:$0xff]  ;;  %v176_v3 = vld [vmem:[#allocation5 + $0x8] sm:$0xff] }
  0x49   : > { %2051 = vsyncadd (%p2384_p6), [#allocation6], 4294966784  ;;  %1755 = vmatprep.subr.mxu0 %v2076_v0  ;;  %1766 = vmatprep.subr.mxu1 %v2076_v0  ;;  %v2223_v4 = vand.u32 4294901760, %v178_v1  ;;  %v2225_v5 = vand.u32 4294901760, %v177_v2  ;;  %v2227_v6 = vand.u32 4294901760, %v176_v3  ;;  %v175_v7 = vld [vmem:[#allocation5] sm:$0xff] }
  0x4a   : > { %1763 = vmatprep.mubr.msk.f32.mxu0 %vm2077_vm0, %v2076_v0  ;;  %1774 = vmatprep.mubr.msk.f32.mxu1 %vm2077_vm0, %v2076_v0  ;;  %v174_v8 = vld [vmem:[%s149_s22] sm:$0xff]  ;;  %v2229_v9 = vand.u32 4294901760, %v175_v7  ;;  %vm671_vm2 = vcmask 130048   ;;  %s2078_s15 = smov 112   ;;  %vm1128_vm4 = vcmask 64512   ;;  %s2079_s17 = smov 96  }
  0x4b   : > { %v181_v10 = vsel %vm179_vm1, %v174_v8, 0  ;;  %1756 = vmatpush3.msra.mxu0 %v2223_v4  ;;  %v288_v11 = vsub.f32 %v178_v1, %v2223_v4  ;;  %v295_v13 = vsub.f32 %v177_v2, %v2225_v5  ;;  %v302_v14 = vsub.f32 %v176_v3, %v2227_v6  ;;  %s1698_s8 = sshll.u32 %s2117_s13, 7  ;;  %s173_s18 = scalar_lea.vmem [#allocation7], %s1694_s7 }
  0x4c   : > { %v2233_v12 = vand.u32 4294901760, %v181_v10  ;;  %1757 = vmatprep.subr.mxu0 %v2076_v0  ;;  %v309_v15 = vsub.f32 %v175_v7, %v2229_v9  ;;  %v1122_v7 = vlaneseq  ;;  %s1607_s19 = sshll.u32 %s173_s18, 4  ;;  %s1605_s24 = scalar_lea.hbm %s2369_s2, %s1698_s8  ;;  %s1608_s19 = int_to_ptr.vmem [resolvable:$true] %s1607_s19 }
  0x4d   : > { %1758 = vmatpush3.msra.mxu0 %v2225_v5  ;;  %v289_v16 = vand.u32 4294901760, %v288_v11  ;;  %v296_v18 = vand.u32 4294901760, %v295_v13  ;;  %v303_v19 = vand.u32 4294901760, %v302_v14  ;;  %s1594_s25 = scalar_lea.sflag [#allocation4], %s2203_s6  ;;  %s2002_s26 = scalar_lea.vmem %s1608_s19, 128 }
  0x4e   : > { %v253_v17 = vsub.f32 %v181_v10, %v2233_v12  ;;  %1759 = vmatprep.subr.mxu0 %v2076_v0  ;;  %v310_v20 = vand.u32 4294901760, %v309_v15  ;;  %p2003_p8 = scmp.ne.s32.totalorder %s1608_s19, %s2002_s26  ;;  %p2385_p3 = scmp.ne.s32.totalorder %s2379_s30, 0 }
  0x4f   : > { %1760 = vmatpush3.msra.mxu0 %v2227_v6  ;;  %v290_v21 = vsub.f32 %v288_v11, %v289_v16  ;;  %v297_v23 = vsub.f32 %v295_v13, %v296_v18  ;;  %v304_v24 = vsub.f32 %v302_v14, %v303_v19  ;;  %s2080_s13 = smov [#allocation7]  }
  0x50   : > { %v254_v22 = vand.u32 4294901760, %v253_v17  ;;  %1761 = vmatprep.subr.mxu0 %v2076_v0  ;;  %v311_v28 = vsub.f32 %v309_v15, %v310_v20  ;;  %p2004_p11 = pnand %p2003_p8, %p2385_p3  ;;  %s2006_s27 = sshll.u32 %s2080_s13, 4  ;;  %s2007_s27 = int_to_ptr.vmem [resolvable:$false] %s2006_s27 }
  0x51   : > { %1762 = vmatpush3.msra.mxu0 %v2229_v9  ;;  %v291_v25 = vand.u32 4294901760, %v290_v21  ;;  %v298_v27 = vand.u32 4294901760, %v297_v23  ;;  %v305_v30 = vand.u32 4294901760, %v304_v24  ;;  %s2008_s28 = scalar_lea.vmem %s2007_s27, 256  ;;  %p2009_p10 = scmp.lt.s32.totalorder %s1608_s19, %s2007_s27 }
  0x52   : > { %v255_v26 = vsub.f32 %v253_v17, %v254_v22  ;;  %1777 = vmatprep.subr.mxu0 %v2076_v0  ;;  %v312_v31 = vand.u32 4294901760, %v311_v28  ;;  %p2005_p7 = pneg %p2004_p11  ;;  %p2010_p2 = scmp.lt.s32.totalorder %s2008_s28, %s2002_s26 }
  0x53   : > { %1767 = vmatpush3.msra.mxu1 %v291_v25 }
  0x54   : > { %v256_v29 = vand.u32 4294901760, %v255_v26  ;;  %1768 = vmatprep.subr.mxu1 %v2076_v0  ;;  %p2011_p13 = por %p2010_p2, %p2009_p10 }
  0x55   : > { %1769 = vmatpush3.msra.mxu1 %v298_v27 }
  0x56   : > { %1764 = vmatmul.mubr.f32.vlgmr.msra.gmra.mxu0 %v256_v29  ;;  %1770 = vmatprep.subr.mxu1 %v2076_v0  ;;  %p2012_p0 = pnand %p2011_p13, %p2005_p7 }
  0x57   : > { %1778 = vmatpush3.msra.mxu0 %v288_v11  ;;  %1771 = vmatpush3.msra.mxu1 %v305_v30 }
  0x58   : > { %1779 = vmatprep.subr.mxu0 %v2076_v0  ;;  %1772 = vmatprep.subr.mxu1 %v2076_v0 }
  0x59   : > { %1780 = vmatpush3.msra.mxu0 %v295_v13  ;;  %1773 = vmatpush3.msra.mxu1 %v312_v31  ;;  %v1125_v13 = vand.u32 127, %v1122_v7 }
  0x5a   : > { %1781 = vmatprep.subr.mxu0 %v2076_v0  ;;  %1775 = vmatmul.mubr.f32.vlgmr.msra.gmra.mxu1 %v2233_v12 }
  0x5b   : > { %1782 = vmatpush3.msra.mxu0 %v302_v14  ;;  %1788 = vmatprep.subr.mxu1 %v2076_v0 }
  0x5c   : > { %1783 = vmatprep.subr.mxu0 %v2076_v0  ;;  %1785 = vmatprep.mubr.msk.f32.mxu0 %vm2077_vm0, %v2076_v0 }
  0x5d   : > { %1784 = vmatpush3.msra.mxu0 %v309_v15  ;;  %1789 = vmatpush3.msra.mxu1 %v2223_v4 }
  0x5e   : > { %1786 = vmatmul.mubr.f32.vlgmr.msra.gmra.mxu0 %v253_v17  ;;  %1790 = vmatprep.subr.mxu1 %v2076_v0 }
  0x5f   : > { %1799 = vmatprep.subr.mxu0 %v2076_v0  ;;  %1791 = vmatpush3.msra.mxu1 %v2225_v5 }
  0x60   : > { %1800 = vmatpush3.msra.mxu0 %v289_v16  ;;  %1792 = vmatprep.subr.mxu1 %v2076_v0 }
  0x61   : > { %1801 = vmatprep.subr.mxu0 %v2076_v0  ;;  %1793 = vmatpush3.msra.mxu1 %v2227_v6 }
  0x62   : > { %1802 = vmatpush3.msra.mxu0 %v296_v18  ;;  %1794 = vmatprep.subr.mxu1 %v2076_v0 }
  0x63   : > { %1803 = vmatprep.subr.mxu0 %v2076_v0  ;;  %1795 = vmatpush3.msra.mxu1 %v2229_v9 }
  0x64   : > { %1796 = vmatprep.mubr.msk.f32.mxu1 %vm2077_vm0, %v2076_v0  ;;  %1804 = vmatpush3.msra.mxu0 %v303_v19 }
  0x65   : > { %1797 = vmatmul.mubr.f32.vlgmr.msra.gmra.mxu1 %v254_v22  ;;  %1805 = vmatprep.subr.mxu0 %v2076_v0 }
  0x66   : > { %1810 = vmatprep.subr.mxu1 %v2076_v0  ;;  %1806 = vmatpush3.msra.mxu0 %v310_v20 }
  0x67   : > { %1807 = vmatprep.mubr.msk.f32.mxu0 %vm2077_vm0, %v2076_v0  ;;  %1811 = vmatpush3.msra.mxu1 %v2223_v4 }
  0x68   : > { %1808 = vmatmul.mubr.f32.vlgmr.msra.gmra.mxu0 %v2233_v12  ;;  %1812 = vmatprep.subr.mxu1 %v2076_v0 }
  0x69   : > { %1818 = vmatprep.mubr.msk.f32.mxu1 %vm2077_vm0, %v2076_v0  ;;  %1813 = vmatpush3.msra.mxu1 %v2225_v5 }
  0x6a   : > { %1821 = vmatprep.subr.mxu0 %v2076_v0  ;;  %1814 = vmatprep.subr.mxu1 %v2076_v0 }
  0x6b   : > { %1823 = vmatprep.mubr.msk.f32.mxu0 %vm2077_vm0, %v2076_v0  ;;  %1815 = vmatpush3.msra.mxu1 %v2227_v6 }
  0x6c   : > { %1816 = vmatprep.subr.mxu1 %v2076_v0 }
  0x6d   : > { %1817 = vmatpush3.msra.mxu1 %v2229_v9 }
  0x6e   : > { %1819 = vmatmul.mubr.f32.vlgmr.msra.gmra.mxu1 %v2233_v12  ;;  %1826 = vmatprep.subr.mxu1 %v2076_v0  ;;  %v1123_v12 = vshrl.u32 %v1122_v7, 7 }
  0x6f   : > { %1828 = vmatprep.mubr.msk.f32.mxu1 %vm2077_vm0, %v2076_v0 }
  0x70   : > { %vm1126_vm3 = vcmp.le.s32.totalorder %v1125_v13, %v1123_v12 }
 0x116   : > { %v258_v32 = vpop.f32.mrf.mxu0 }
 0x118   : > { %v1765_v33 = vpop.f32.mrf.mxu0 }
 0x11a   : > { %v349_v34 = vpop.f32.mrf.mxu1 }
 0x11b   : > { %v350_v38 = vadd.f32 %v349_v34, %v258_v32 }
 0x11c   : > { %v1776_v35 = vpop.f32.mrf.mxu1 }
 0x11e   : > { %v429_v36 = vpop.f32.mrf.mxu0 }
 0x11f   : > { %v430_v41 = vadd.f32 %v429_v36, %v350_v38 }
 0x120   : > { %v1787_v37 = vpop.f32.mrf.mxu0 }
 0x125   : > { %v506_v39 = vpop.f32.mrf.mxu1 }
 0x126   : > { %v507_v43 = vadd.f32 %v506_v39, %v430_v41 }
 0x127   : > { %v1798_v40 = vpop.f32.mrf.mxu1 }
 0x128   : > { %v589_v42 = vpop.f32.mrf.mxu0 }
 0x129   : > { %v590_v45 = vadd.f32 %v589_v42, %v507_v43 }
 0x12a   : > { %v1809_v44 = vpop.f32.mrf.mxu0 }
 0x12e   : > { %v664_v46 = vpop.f32.mrf.mxu1 }
 0x12f   : > { %v2289_v47 = vadd.f32 %v664_v46, %v590_v45 }
 0x130   : > { %v1820_v48 = vpop.f32.mrf.mxu1 }
 0x131   : > { %v674_v49 = vsel %vm671_vm2, %v2289_v47, 0  ;;  %669 = vrot.lane.b32.xlu0 %v2289_v47, %s2078_s15 }
 0x132   : > { %v707_v50 = vand.u32 4294901760, %v674_v49 }
 0x134   : > { %v784_v51 = vsub.f32 %v674_v49, %v707_v50  ;;  %1822 = vmatpush3.xpose.msra.mxu0 %v707_v50 }
 0x135   : > { %1831 = vmatprep.subr.mxu0 %v2076_v0 }
 0x136   : > { %v785_v52 = vand.u32 4294901760, %v784_v51 }
 0x138   : > { %v786_v53 = vsub.f32 %v784_v51, %v785_v52 }
 0x13a   : > { %v787_v54 = vand.u32 4294901760, %v786_v53 }
 0x13c   : > { %1827 = vmatpush3.xpose.msra.mxu1 %v787_v54 }
 0x13d   : > { %1836 = vmatprep.subr.mxu1 %v2076_v0 }
 0x1a3   : > { %v670_v55 = vpop.permute.xlu0 %669 }
 0x1a4   : > { %v672_v56 = vsel %vm671_vm2, %v670_v55, 0 }
 0x1a5   : > { %v742_v57 = vand.u32 4294901760, %v672_v56 }
 0x1a7   : > { %v743_v58 = vsub.f32 %v672_v56, %v742_v57  ;;  %1829 = vmatmul.mubr.f32.vlgmr.msra.gmra.mxu1 %v742_v57 }
 0x1a8   : > { %1837 = vmatpush3.xpose.msra.mxu1 %v707_v50  ;;  %1838 = vmatprep.mubr.msk.f32.mxu1 %vm2077_vm0, %v2076_v0 }
 0x1a9   : > { %v744_v59 = vand.u32 4294901760, %v743_v58  ;;  %1846 = vmatprep.subr.mxu1 %v2076_v0 }
 0x1ab   : > { %v745_v60 = vsub.f32 %v743_v58, %v744_v59  ;;  %1839 = vmatmul.mubr.f32.vlgmr.msra.gmra.mxu1 %v744_v59 }
 0x1ac   : > { %1847 = vmatpush3.xpose.msra.mxu1 %v707_v50  ;;  %1848 = vmatprep.mubr.msk.f32.mxu1 %vm2077_vm0, %v2076_v0 }
 0x1ad   : > { %v746_v61 = vand.u32 4294901760, %v745_v60  ;;  %1856 = vmatprep.subr.mxu1 %v2076_v0 }
 0x1af   : > { %1824 = vmatmul.mubr.f32.vlgmr.msra.gmra.mxu0 %v746_v61  ;;  %1849 = vmatmul.mubr.f32.vlgmr.msra.gmra.mxu1 %v742_v57 }
 0x1b0   : > { %1832 = vmatpush3.xpose.msra.mxu0 %v784_v51  ;;  %1833 = vmatprep.mubr.msk.f32.mxu0 %vm2077_vm0, %v2076_v0 }
 0x1b1   : > { %1841 = vmatprep.subr.mxu0 %v2076_v0  ;;  %1858 = vmatprep.mubr.msk.f32.mxu1 %vm2077_vm0, %v2076_v0 }
 0x1b3   : > { %1834 = vmatmul.mubr.f32.vlgmr.msra.gmra.mxu0 %v743_v58 }
 0x1b4   : > { %1842 = vmatpush3.xpose.msra.mxu0 %v785_v52  ;;  %1843 = vmatprep.mubr.msk.f32.mxu0 %vm2077_vm0, %v2076_v0 }
 0x1b5   : > { %1851 = vmatprep.subr.mxu0 %v2076_v0 }
 0x1b7   : > { %1844 = vmatmul.mubr.f32.vlgmr.msra.gmra.mxu0 %v742_v57 }
 0x1b8   : > { %1853 = vmatprep.mubr.msk.f32.mxu0 %vm2077_vm0, %v2076_v0 }
 0x267   : > { %v824_v62 = vpop.f32.mrf.mxu1 }
 0x269   : > { %v1830_v63 = vpop.f32.mrf.mxu1 }
 0x26b   : > { %v972_v1 = vpop.f32.mrf.mxu1 }
 0x26d   : > { %v1840_v2 = vpop.f32.mrf.mxu1 }
 0x26f   : > { %v748_v3 = vpop.f32.mrf.mxu0  ;;  %v1118_v4 = vpop.f32.mrf.mxu1 }
 0x270   : > { %v825_v8 = vadd.f32 %v824_v62, %v748_v3 }
 0x271   : > { %v1825_v5 = vpop.f32.mrf.mxu0  ;;  %v1850_v6 = vpop.f32.mrf.mxu1 }
 0x273   : > { %v898_v9 = vpop.f32.mrf.mxu0 }
 0x274   : > { %v899_v10 = vadd.f32 %v898_v9, %v825_v8 }
 0x275   : > { %v1835_v11 = vpop.f32.mrf.mxu0 }
 0x276   : > { %v973_v14 = vadd.f32 %v972_v1, %v899_v10 }
 0x277   : > { %v1046_v15 = vpop.f32.mrf.mxu0 }
 0x278   : > { %v1047_v16 = vadd.f32 %v1046_v15, %v973_v14 }
 0x279   : > { %v1845_v17 = vpop.f32.mrf.mxu0 }
 0x27a   : > { %v1119_v18 = vadd.f32 %v1118_v4, %v1047_v16 }
 0x27c   : > { %v1127_v19 = vsel %vm1126_vm3, %v1119_v18, -inf }
 0x27d   : > { %v1129_v20 = vsel %vm1128_vm4, %v1127_v19, -inf }
 0x27e   : > { %1130 = vmax.xlane.f32.xlu0 %v1129_v20 }
 0x307   : > { %v1131_v21 = vpop.xlane.xlu0 %1130 }
 0x308   : > { %v1132_v22 = vsub.f32 %v1127_v19, %v1131_v21 }
 0x30a   : > { %v1133_v23 = vmul.f32 1.442695, %v1132_v22 }
 0x30c   : > { %1944 = vpow2.f32 %v1133_v23 }
 0x319   : > { %v1945_v24 = vpop.eup %1944 }
 0x31a   : > { %v1135_v25 = vsel %vm1128_vm4, %v1945_v24, 0.0 }
 0x31b   : > { %1136 = vadd.xlane.f32.xlu1 %v1135_v25 }
 0x32c   : > { %1140 = vrot.lane.b32.xlu1 %v2289_v47, %s2079_s17 }
 0x3a4   : > { %v1137_v26 = vpop.xlane.xlu1 %1136 }
 0x3a5   : > { %1946 = vrcp.f32 %v1137_v26 }
 0x3a8   : > { %v1141_v27 = vpop.permute.xlu1 %1140 }
 0x3a9   : > { %v1177_v28 = vand.u32 4294901760, %v1141_v27 }
 0x3ab   : > { %v1254_v29 = vsub.f32 %v1141_v27, %v1177_v28  ;;  %1852 = vmatpush3.msra.mxu0 %v1177_v28 }
 0x3ac   : > { %1861 = vmatprep.subr.mxu0 %v2076_v0 }
 0x3ad   : > { %v1255_v30 = vand.u32 4294901760, %v1254_v29 }
 0x3af   : > { %v1256_v31 = vsub.f32 %v1254_v29, %v1255_v30 }
 0x3b1   : > { %v1257_v32 = vand.u32 4294901760, %v1256_v31 }
 0x3b2   : > { %v1947_v33 = vpop.eup %1946 }
 0x3b3   : > { %1857 = vmatpush3.msra.mxu1 %v1257_v32  ;;  %v1139_v34 = vmul.f32 %v1947_v33, %v1945_v24 }
 0x3b4   : > { %1866 = vmatprep.subr.mxu1 %v2076_v0 }
 0x3b5   : > { %v1144_v35 = vsel %vm1128_vm4, %v1139_v34, 0 }
 0x3b6   : > { %v1212_v36 = vand.u32 4294901760, %v1144_v35 }
 0x3b8   : > { %v1213_v37 = vsub.f32 %v1144_v35, %v1212_v36  ;;  %1859 = vmatmul.mubr.f32.vlgmr.msra.gmra.mxu1 %v1212_v36 }
 0x3b9   : > { %1867 = vmatpush3.msra.mxu1 %v1177_v28  ;;  %1868 = vmatprep.mubr.msk.f32.mxu1 %vm2077_vm0, %v2076_v0 }
 0x3ba   : > { %1876 = vmatprep.subr.mxu1 %v2076_v0  ;;  %v1214_v38 = vand.u32 4294901760, %v1213_v37 }
 0x3bc   : > { %1869 = vmatmul.mubr.f32.vlgmr.msra.gmra.mxu1 %v1214_v38  ;;  %v1215_v39 = vsub.f32 %v1213_v37, %v1214_v38 }
 0x3bd   : > { %1877 = vmatpush3.msra.mxu1 %v1177_v28  ;;  %1878 = vmatprep.mubr.msk.f32.mxu1 %vm2077_vm0, %v2076_v0 }
 0x3be   : > { %v1216_v40 = vand.u32 4294901760, %v1215_v39 }
 0x3c0   : > { %1854 = vmatmul.mubr.f32.vlgmr.msra.gmra.mxu0 %v1216_v40  ;;  %1879 = vmatmul.mubr.f32.vlgmr.msra.gmra.mxu1 %v1212_v36 }
 0x3c1   : > { %1862 = vmatpush3.msra.mxu0 %v1254_v29  ;;  %1863 = vmatprep.mubr.msk.f32.mxu0 %vm2077_vm0, %v2076_v0 }
 0x3c2   : > { %1871 = vmatprep.subr.mxu0 %v2076_v0 }
 0x3c4   : > { %1864 = vmatmul.mubr.f32.vlgmr.msra.gmra.mxu0 %v1213_v37 }
 0x3c5   : > { %1872 = vmatpush3.msra.mxu0 %v1255_v30  ;;  %1873 = vmatprep.mubr.msk.f32.mxu0 %vm2077_vm0, %v2076_v0 }
 0x3c8   : > { %1874 = vmatmul.mubr.f32.vlgmr.msra.gmra.mxu0 %v1212_v36 }
 0x478   : > { %v1294_v41 = vpop.f32.mrf.mxu1 }
 0x47a   : > { %v1860_v42 = vpop.f32.mrf.mxu1 }
 0x47c   : > { %v1442_v43 = vpop.f32.mrf.mxu1 }
 0x47e   : > { %v1870_v44 = vpop.f32.mrf.mxu1 }
 0x480   : > { %v1218_v45 = vpop.f32.mrf.mxu0  ;;  %v1588_v46 = vpop.f32.mrf.mxu1 }
 0x481   : > { %v1295_v49 = vadd.f32 %v1294_v41, %v1218_v45 }
 0x482   : > { %v1855_v47 = vpop.f32.mrf.mxu0  ;;  %v1880_v48 = vpop.f32.mrf.mxu1 }
 0x484   : > { %v1368_v50 = vpop.f32.mrf.mxu0 }
 0x485   : > { %v1369_v51 = vadd.f32 %v1368_v50, %v1295_v49 }
 0x486   : > { %v1865_v52 = vpop.f32.mrf.mxu0 }
 0x487   : > { %v1443_v53 = vadd.f32 %v1442_v43, %v1369_v51 }
 0x488   : > { %v1516_v54 = vpop.f32.mrf.mxu0 }
 0x489   : > { %v1517_v0 = vadd.f32 %v1516_v54, %v1443_v53 }
 0x48a   : > { %v1875_v55 = vpop.f32.mrf.mxu0 }
 0x48b   : > { %v1589_v56 = vadd.f32 %v1588_v46, %v1517_v0 }
 0x48d   : > { %1592 = vst.msk [vmem:[%s173_s18] sm:$0xff] %vm671_vm2, %v1589_v56 }
 0x48e   : > { %2015 = shalt.err (!%p2012_p0)
}
 0x48f   : > { %s2016_s3 = scalar_lea.hbm %s1605_s24, 128  ;;  %s2020_s6 = scalar_lea.hbm %s2369_s2, 256 }
 0x490   : > { %p2017_p5 = scmp.ne.s32.totalorder %s1605_s24, %s2016_s3  ;;  %p2021_p1 = scmp.lt.s32.totalorder %s1605_s24, %s2369_s2 }
 0x491   : > { %p2022_p4 = scmp.lt.s32.totalorder %s2020_s6, %s2016_s3 }
 0x492   : > { %p2018_p9 = pnand %p2017_p5, %p2385_p3 }
 0x493   : > { %p2023_p6 = por %p2022_p4, %p2021_p1 }
 0x494   : > { %p2019_p12 = pneg %p2018_p9 }
 0x496   : > { %p2024_p8 = pnand %p2023_p6, %p2019_p12 }
 0x498   : > { %2027 = shalt.err (!%p2024_p8)
}
 0x499   : > { %1887 = dma.vmem_to_hbm [thread:$0]  (%p2385_p3), %s1608_s19, 128, %s1605_s24, %s1594_s25  }
 0x49a PF: > { %s1619_s22 = sand.u32 1, %s2058_s9   ;;  %p2386_p11 = scmp.ne.s32.totalorder %s2375_s16, 0 }
 0x49b   : > { %p2387_p7 = scmp.ge.s32.totalorder %s2070_s12, 2  ;;  %s1620_s15 = scalar_lea.sflag [#allocation4], %s1619_s22 }
 0x49d   : > { %p1898_p10 = pnand %p2387_p7, %p2386_p11 }
 0x49f   : > { %p1899_p2 = pneg %p1898_p10 }
 0x4a1   : > { %2053 = dma.done.wait (%p1899_p2), %s1620_s15, 128  }
 0x4a2   : > { %2055 = vsyncadd (%p1899_p2), %s1620_s15, 4294967168  ;;  %p16_p13 = scmp.ge.s32.totalorder %s2150_s21, 4   ;;  %s2388_s9 = smov %s2062_s10 }
 0x4a3   : > { %s2389_s10 = smov %s2066_s11  ;;  %s2390_s11 = smov %s2167_s29 }
 0x4a4   : > { %s2391_s12 = smov %s2150_s21  ;;  %18 = sbr.rel (!%p16_p13) target bundleno = 6 (0x6), region = 77 }
 0x4a9   :  { %1625 = vsyncpa [#allocation3], 1 }
 0x4aa   :  { %1627 = vsyncpa [#allocation3 + $0x1], 1 }
 0x4ab   :  { %1628 = vsyncpa [#allocation6], 1 }
 0x4ac   :  { %1629 = vsyncpa [#allocation4], 1 }
 0x4ad   :  { %1631 = vsyncpa [#allocation4 + $0x1], 1 }

</bundles_post_ra>
